<compile_context>
chip_gen: v7x
topology: tpu7x:2x2x1
jax: 0.10.0
libtpu: 0.0.40
codegen_flags: <defaults>
</compile_context>

<pallas_src>
import math

import jax
import jax.numpy as jnp
from jax import lax
from jax.experimental import pallas as pl
from jax.experimental.pallas import tpu as pltpu

# ---- HEncLayer hyper-parameters (module defaults, freq branch) ----
CHIN = 4
CHOUT = 8
KSIZE = 8
STRIDE = 4
PAD = KSIZE // 4            # pad=True -> kernel_size // 4
EPS = 1e-5                  # GroupNorm eps (PyTorch default)

# ---- problem sizes ----
B, FR, T = 2, 16, 8
FR_PAD = FR + 2 * PAD
FR_OUT = (FR_PAD - KSIZE) // STRIDE + 1        # == FR // STRIDE
FT = FR_OUT * T                                # per-sample spatial size after conv
BFT = B * FT                                   # lane extent of the compute slab
KC = KSIZE * CHIN                              # im2col contraction size


def _erf_f32(x):
    # Abramowitz & Stegun 7.1.26 rational approximation, |err| <= 1.5e-7
    # (lax.erf has no Mosaic lowering).  Sign handled by one final select.
    p = 0.3275911
    a1, a2, a3, a4, a5 = (0.254829592, -0.284496736, 1.421413741,
                          -1.453152027, 1.061405429)
    ax = jnp.abs(x)
    t = 1.0 / (1.0 + p * ax)   # plain divide: safe in both Mosaic & interpret
    poly = ((((a5 * t + a4) * t + a3) * t + a2) * t + a1) * t
    y = 1.0 - poly * jnp.exp(-ax * ax)
    return jnp.where(x >= 0, y, -y)


def _gelu_exact(x):
    # matches torch.nn.functional.gelu (erf-based, non-approximate)
    return 0.5 * x * (1.0 + _erf_f32(x * (1.0 / math.sqrt(2.0))))


def henc_layer_kernel(patch_ref, w1_ref, n1_ref, w2_ref, p2_ref, o_ref):
    # patch_ref: (KC+1, BFT)  im2col patches, last row = ones (bias rider)
    # w1_ref   : (CHOUT, KC+1)  freq-conv weight, last column = conv bias
    # n1_ref   : (CHOUT, 2)     packed [norm1 gamma, norm1 beta]
    # w2_ref   : (2*CHOUT, CHOUT)  1x1 rewrite-conv weight
    # p2_ref   : (2*CHOUT, 3)   packed [rewrite bias, norm2 gamma, norm2 beta]
    # o_ref    : (CHOUT, BFT)   lane-dense output slab (columns = b, fr_out, t)
    patch = patch_ref[...]
    w1 = w1_ref[...]
    w2 = w2_ref[...]
    g1, be1 = n1_ref[:, 0:1], n1_ref[:, 1:2]                 # (CHOUT, 1)
    b2, g2, be2 = p2_ref[:, 0:1], p2_ref[:, 1:2], p2_ref[:, 2:3]  # (2*CHOUT, 1)

    # ---- frequency conv: one MXU push for the whole batch, bias folded in ----
    conv = jnp.dot(w1, patch, precision=lax.Precision.HIGHEST,
                   preferred_element_type=jnp.float32)        # (CHOUT, BFT)

    # lanes [0, FT) belong to sample 0, lanes [FT, 2*FT) to sample 1 (B == 2)
    lane = lax.broadcasted_iota(jnp.int32, (1, BFT), 1)
    in_s0 = lane < FT

    # ---- GroupNorm(1, CHOUT): fused one-pass per-sample stats on the slab ----
    # NOTE: one-pass E[x^2]-E[x]^2 in fp32; fine for activation-scale data.
    col_s = jnp.sum(conv, axis=0, keepdims=True)              # (1, BFT)
    col_q = jnp.sum(conv * conv, axis=0, keepdims=True)
    s_all = jnp.sum(col_s, keepdims=True)                     # (1, 1)
    q_all = jnp.sum(col_q, keepdims=True)
    s0 = jnp.sum(jnp.where(in_s0, col_s, 0.0), keepdims=True)
    q0 = jnp.sum(jnp.where(in_s0, col_q, 0.0), keepdims=True)
    inv_n1 = 1.0 / float(CHOUT * FT)
    mean = jnp.where(in_s0, s0, s_all - s0) * inv_n1          # (1, BFT)
    msq = jnp.where(in_s0, q0, q_all - q0) * inv_n1
    rstd = lax.rsqrt(msq - mean * mean + EPS)
    scale = g1 * rstd                                         # (CHOUT, BFT)
    shift = be1 - mean * scale
    y = _gelu_exact(conv * scale + shift)                     # exact (erf) GELU

    # TODO(synk): DConv residual branch (dconv=True) and the `inject` addition
    # are not implemented; this covers the dconv=False / inject=None path.

    # ---- rewrite: 1x1 conv CHOUT -> 2*CHOUT, one push for the whole batch ----
    z = jnp.dot(w2, y, precision=lax.Precision.HIGHEST,
                preferred_element_type=jnp.float32) + b2       # (2*CHOUT, BFT)

    # ---- GroupNorm(1, 2*CHOUT), same fused per-sample stats ----
    col_s2 = jnp.sum(z, axis=0, keepdims=True)
    col_q2 = jnp.sum(z * z, axis=0, keepdims=True)
    s_all2 = jnp.sum(col_s2, keepdims=True)
    q_all2 = jnp.sum(col_q2, keepdims=True)
    s02 = jnp.sum(jnp.where(in_s0, col_s2, 0.0), keepdims=True)
    q02 = jnp.sum(jnp.where(in_s0, col_q2, 0.0), keepdims=True)
    inv_n2 = 1.0 / float(2 * CHOUT * FT)
    mean2 = jnp.where(in_s0, s02, s_all2 - s02) * inv_n2
    msq2 = jnp.where(in_s0, q02, q_all2 - q02) * inv_n2
    rstd2 = lax.rsqrt(msq2 - mean2 * mean2 + EPS)
    scale2 = g2 * rstd2
    shift2 = be2 - mean2 * scale2
    z = z * scale2 + shift2

    # ---- GLU along the channel (sublane) dim: one lane-dense store ----
    o_ref[...] = z[:CHOUT, :] * jax.nn.sigmoid(z[CHOUT:, :])


def henc_layer_forward(x_nchw, params):
    """x_nchw: (B, CHIN, FR, T) float32 -> (B, CHOUT, FR_OUT, T) float32."""
    # glue: zero-pad the frequency axis and build the lane-dense im2col patch.
    # KSIZE == 2*STRIDE, so output position s covers stride-groups s and s+1:
    # pure reshape / slice / concat / transpose, no gather.
    xp = jnp.pad(x_nchw, ((0, 0), (0, 0), (PAD, PAD), (0, 0)))        # (B,CHIN,FR_PAD,T)
    xg = xp.reshape(B, CHIN, FR_PAD // STRIDE, STRIDE, T)             # (B,CHIN,5,S,T)
    win = jnp.concatenate([xg[:, :, :FR_OUT], xg[:, :, 1:FR_OUT + 1]],
                          axis=3)                                     # (B,CHIN,FR_OUT,K,T)
    patch = win.transpose(3, 1, 0, 2, 4).reshape(KC, BFT)             # rows=k*CHIN+ci
    patch = jnp.concatenate([patch, jnp.ones((1, BFT), jnp.float32)],
                            axis=0)                                   # (KC+1, BFT)

    # glue: reshape PyTorch conv weights, fold conv bias, pack norm params
    w1 = jnp.transpose(params["w1"][..., 0], (0, 2, 1)).reshape(CHOUT, KC)
    w1 = jnp.concatenate([w1, params["b1"][:, None]], axis=1)         # (CHOUT, KC+1)
    w2 = params["w2"][:, :, 0, 0]                                     # (2*CHOUT, CHOUT)
    n1 = jnp.stack([params["g1"], params["be1"]], axis=1)             # (CHOUT, 2)
    p2 = jnp.stack([params["b2"], params["g2"], params["be2"]], axis=1)  # (2*CHOUT, 3)

    vmem_spec = pl.BlockSpec(memory_space=pltpu.MemorySpace.VMEM)
    out = pl.pallas_call(
        henc_layer_kernel,
        out_shape=jax.ShapeDtypeStruct((CHOUT, BFT), jnp.float32),
        in_specs=[vmem_spec] * 5,
        out_specs=vmem_spec,
        cost_estimate=pl.CostEstimate(flops=120_000, transcendentals=1_200,
                                      bytes_accessed=13_000),
    )(patch, w1, n1, w2, p2)

    # glue: free reshape/transpose back to PyTorch NCHW convention
    return out.reshape(CHOUT, B, FR_OUT, T).transpose(1, 0, 2, 3)


# ---------------- pure-JAX reference (PyTorch semantics) ----------------
def _group_norm_ref(x, gamma, beta):
    # GroupNorm with num_groups=1: per-sample stats over (C, H, W)
    mean = x.mean(axis=(1, 2, 3), keepdims=True)
    var = ((x - mean) ** 2).mean(axis=(1, 2, 3), keepdims=True)
    xn = (x - mean) * lax.rsqrt(var + EPS)
    return xn * gamma.reshape(1, -1, 1, 1) + beta.reshape(1, -1, 1, 1)


def henc_layer_reference(x, params):
    dn = ("NCHW", "OIHW", "NCHW")
    y = lax.conv_general_dilated(x, params["w1"], (STRIDE, 1),
                                 ((PAD, PAD), (0, 0)), dimension_numbers=dn,
                                 precision=lax.Precision.HIGHEST)
    y = y + params["b1"].reshape(1, -1, 1, 1)
    y = jax.nn.gelu(_group_norm_ref(y, params["g1"], params["be1"]),
                    approximate=False)
    z = lax.conv_general_dilated(y, params["w2"], (1, 1), ((0, 0), (0, 0)),
                                 dimension_numbers=dn,
                                 precision=lax.Precision.HIGHEST)
    z = z + params["b2"].reshape(1, -1, 1, 1)
    z = _group_norm_ref(z, params["g2"], params["be2"])
    a, g = jnp.split(z, 2, axis=1)
    return a * jax.nn.sigmoid(g)


if __name__ == "__main__":
    key = jax.random.PRNGKey(0)
    kx, kw1, kb1, kw2, kb2 = jax.random.split(key, 5)
    x = jax.random.normal(kx, (B, CHIN, FR, T), jnp.float32)
    params = {
        # nn.Conv2d(chin, chout, [K, 1], [S, 1], [pad, 0]) weight/bias
        "w1": 0.2 * jax.random.normal(kw1, (CHOUT, CHIN, KSIZE, 1), jnp.float32),
        "b1": 0.1 * jax.random.normal(kb1, (CHOUT,), jnp.float32),
        # GroupNorm(1, chout) affine params (PyTorch init: ones / zeros)
        "g1": jnp.ones((CHOUT,), jnp.float32),
        "be1": jnp.zeros((CHOUT,), jnp.float32),
        # nn.Conv2d(chout, 2*chout, 1, 1, 0) ("rewrite") weight/bias
        "w2": 0.2 * jax.random.normal(kw2, (2 * CHOUT, CHOUT, 1, 1), jnp.float32),
        "b2": 0.1 * jax.random.normal(kb2, (2 * CHOUT,), jnp.float32),
        # GroupNorm(1, 2*chout) affine params
        "g2": jnp.ones((2 * CHOUT,), jnp.float32),
        "be2": jnp.zeros((2 * CHOUT,), jnp.float32),
    }

    out = jax.block_until_ready(henc_layer_forward(x, params))
    ref = jax.block_until_ready(henc_layer_reference(x, params))

    assert out.shape == (B, CHOUT, FR_OUT, T), out.shape
    if not jnp.allclose(out, ref, atol=2e-4, rtol=2e-4):
        raise RuntimeError("mismatch vs reference, max abs err = "
                           f"{float(jnp.max(jnp.abs(out - ref)))}")
    print("KERNEL_OK")
</pallas_src>

<mosaic_0001>
module attributes {stable_mosaic.version = 11 : i64} {
  func.func @henc_layer_kernel(%arg0: memref<33x64xf32, #tpu.memory_space<vmem>>, %arg1: memref<8x33xf32, #tpu.memory_space<vmem>>, %arg2: memref<8x2xf32, #tpu.memory_space<vmem>>, %arg3: memref<16x8xf32, #tpu.memory_space<vmem>>, %arg4: memref<16x3xf32, #tpu.memory_space<vmem>>, %arg5: memref<8x64xf32, #tpu.memory_space<vmem>>) attributes {dimension_semantics = [], scalar_prefetch = 0 : i64, scratch_operands = 0 : i64, tpu.core_type = #tpu.core_type<tc>} {
    %c0 = arith.constant 0 : index
    %c0_0 = arith.constant 0 : index
    %0 = vector.load %arg0[%c0, %c0_0] : memref<33x64xf32, #tpu.memory_space<vmem>>, vector<33x64xf32>
    %c0_1 = arith.constant 0 : index
    %c0_2 = arith.constant 0 : index
    %1 = vector.load %arg1[%c0_1, %c0_2] : memref<8x33xf32, #tpu.memory_space<vmem>>, vector<8x33xf32>
    %c0_3 = arith.constant 0 : index
    %c0_4 = arith.constant 0 : index
    %2 = vector.load %arg3[%c0_3, %c0_4] : memref<16x8xf32, #tpu.memory_space<vmem>>, vector<16x8xf32>
    %c0_5 = arith.constant 0 : index
    %c0_6 = arith.constant 0 : index
    %3 = vector.load %arg2[%c0_5, %c0_6] : memref<8x2xf32, #tpu.memory_space<vmem>>, vector<8x1xf32>
    %c0_7 = arith.constant 0 : index
    %c1 = arith.constant 1 : index
    %4 = vector.load %arg2[%c0_7, %c1] : memref<8x2xf32, #tpu.memory_space<vmem>>, vector<8x1xf32>
    %c0_8 = arith.constant 0 : index
    %c0_9 = arith.constant 0 : index
    %5 = vector.load %arg4[%c0_8, %c0_9] : memref<16x3xf32, #tpu.memory_space<vmem>>, vector<16x1xf32>
    %c0_10 = arith.constant 0 : index
    %c1_11 = arith.constant 1 : index
    %6 = vector.load %arg4[%c0_10, %c1_11] : memref<16x3xf32, #tpu.memory_space<vmem>>, vector<16x1xf32>
    %c0_12 = arith.constant 0 : index
    %c2 = arith.constant 2 : index
    %7 = vector.load %arg4[%c0_12, %c2] : memref<16x3xf32, #tpu.memory_space<vmem>>, vector<16x1xf32>
    %cst = arith.constant dense<0.000000e+00> : vector<8x64xf32>
    %8 = tpu.matmul %1, %0, %cst {dimension_numbers = #tpu.dot_dimension_numbers<[1], [0], [0], [1], [0, 0, 1, 1], [], []>, precision = #tpu.contract_precision<fp32>} : vector<8x33xf32>, vector<33x64xf32>, vector<8x64xf32> -> vector<8x64xf32>
    %9 = tpu.iota {dimensions = array<i32: 1>} : vector<1x64xi32>
    %c32_i32 = arith.constant 32 : i32
    %10 = vector.broadcast %c32_i32 : i32 to vector<1x64xi32>
    %11 = arith.cmpi slt, %9, %10 : vector<1x64xi32>
    %cst_13 = arith.constant dense<0.000000e+00> : vector<64xf32>
    %12 = vector.multi_reduction <add>, %8, %cst_13 [0] : vector<8x64xf32> to vector<64xf32>
    %13 = vector.shape_cast %12 : vector<64xf32> to vector<1x64xf32>
    %14 = arith.mulf %8, %8 : vector<8x64xf32>
    %cst_14 = arith.constant dense<0.000000e+00> : vector<64xf32>
    %15 = vector.multi_reduction <add>, %14, %cst_14 [0] : vector<8x64xf32> to vector<64xf32>
    %16 = vector.shape_cast %15 : vector<64xf32> to vector<1x64xf32>
    %17 = vector.shape_cast %13 : vector<1x64xf32> to vector<1x1x64xf32>
    %cst_15 = arith.constant dense<0.000000e+00> : vector<1xf32>
    %18 = vector.multi_reduction <add>, %17, %cst_15 [1, 2] : vector<1x1x64xf32> to vector<1xf32>
    %19 = vector.shape_cast %18 : vector<1xf32> to vector<1x1x1xf32>
    %20 = vector.extract %19[0, 0, 0] : f32 from vector<1x1x1xf32>
    %21 = vector.broadcast %20 : f32 to vector<1x1xf32>
    %22 = vector.shape_cast %16 : vector<1x64xf32> to vector<1x1x64xf32>
    %cst_16 = arith.constant dense<0.000000e+00> : vector<1xf32>
    %23 = vector.multi_reduction <add>, %22, %cst_16 [1, 2] : vector<1x1x64xf32> to vector<1xf32>
    %24 = vector.shape_cast %23 : vector<1xf32> to vector<1x1x1xf32>
    %25 = vector.extract %24[0, 0, 0] : f32 from vector<1x1x1xf32>
    %26 = vector.broadcast %25 : f32 to vector<1x1xf32>
    %cst_17 = arith.constant 0.000000e+00 : f32
    %27 = vector.broadcast %cst_17 : f32 to vector<1x64xf32>
    %28 = arith.select %11, %13, %27 : vector<1x64xi1>, vector<1x64xf32>
    %29 = vector.shape_cast %28 : vector<1x64xf32> to vector<1x1x64xf32>
    %cst_18 = arith.constant dense<0.000000e+00> : vector<1xf32>
    %30 = vector.multi_reduction <add>, %29, %cst_18 [1, 2] : vector<1x1x64xf32> to vector<1xf32>
    %31 = vector.shape_cast %30 : vector<1xf32> to vector<1x1x1xf32>
    %32 = vector.extract %31[0, 0, 0] : f32 from vector<1x1x1xf32>
    %33 = vector.broadcast %32 : f32 to vector<1x1xf32>
    %cst_19 = arith.constant 0.000000e+00 : f32
    %34 = vector.broadcast %cst_19 : f32 to vector<1x64xf32>
    %35 = arith.select %11, %16, %34 : vector<1x64xi1>, vector<1x64xf32>
    %36 = vector.shape_cast %35 : vector<1x64xf32> to vector<1x1x64xf32>
    %cst_20 = arith.constant dense<0.000000e+00> : vector<1xf32>
    %37 = vector.multi_reduction <add>, %36, %cst_20 [1, 2] : vector<1x1x64xf32> to vector<1xf32>
    %38 = vector.shape_cast %37 : vector<1xf32> to vector<1x1x1xf32>
    %39 = vector.extract %38[0, 0, 0] : f32 from vector<1x1x1xf32>
    %40 = vector.broadcast %39 : f32 to vector<1x1xf32>
    %41 = arith.subf %21, %33 : vector<1x1xf32>
    %42 = vector.shape_cast %33 : vector<1x1xf32> to vector<1x1xf32>
    %43 = vector.broadcast %42 : vector<1x1xf32> to vector<1x64xf32>
    %44 = vector.shape_cast %41 : vector<1x1xf32> to vector<1x1xf32>
    %45 = vector.broadcast %44 : vector<1x1xf32> to vector<1x64xf32>
    %46 = arith.select %11, %43, %45 : vector<1x64xi1>, vector<1x64xf32>
    %cst_21 = arith.constant 3.906250e-03 : f32
    %47 = vector.broadcast %cst_21 : f32 to vector<1x64xf32>
    %48 = arith.mulf %46, %47 : vector<1x64xf32>
    %49 = arith.subf %26, %40 : vector<1x1xf32>
    %50 = vector.shape_cast %40 : vector<1x1xf32> to vector<1x1xf32>
    %51 = vector.broadcast %50 : vector<1x1xf32> to vector<1x64xf32>
    %52 = vector.shape_cast %49 : vector<1x1xf32> to vector<1x1xf32>
    %53 = vector.broadcast %52 : vector<1x1xf32> to vector<1x64xf32>
    %54 = arith.select %11, %51, %53 : vector<1x64xi1>, vector<1x64xf32>
    %cst_22 = arith.constant 3.906250e-03 : f32
    %55 = vector.broadcast %cst_22 : f32 to vector<1x64xf32>
    %56 = arith.mulf %54, %55 : vector<1x64xf32>
    %57 = arith.mulf %48, %48 : vector<1x64xf32>
    %58 = arith.subf %56, %57 : vector<1x64xf32>
    %cst_23 = arith.constant 9.99999974E-6 : f32
    %59 = vector.broadcast %cst_23 : f32 to vector<1x64xf32>
    %60 = arith.addf %58, %59 : vector<1x64xf32>
    %61 = math.rsqrt %60 : vector<1x64xf32>
    %62 = vector.broadcast %3 : vector<8x1xf32> to vector<8x64xf32>
    %63 = vector.broadcast %61 : vector<1x64xf32> to vector<8x64xf32>
    %64 = arith.mulf %62, %63 : vector<8x64xf32>
    %65 = vector.broadcast %48 : vector<1x64xf32> to vector<8x64xf32>
    %66 = arith.mulf %65, %64 : vector<8x64xf32>
    %67 = vector.broadcast %4 : vector<8x1xf32> to vector<8x64xf32>
    %68 = arith.subf %67, %66 : vector<8x64xf32>
    %69 = arith.mulf %8, %64 : vector<8x64xf32>
    %70 = arith.addf %69, %68 : vector<8x64xf32>
    %cst_24 = arith.constant 5.000000e-01 : f32
    %71 = vector.broadcast %cst_24 : f32 to vector<8x64xf32>
    %72 = arith.mulf %71, %70 : vector<8x64xf32>
    %cst_25 = arith.constant 0.707106769 : f32
    %73 = vector.broadcast %cst_25 : f32 to vector<8x64xf32>
    %74 = arith.mulf %70, %73 : vector<8x64xf32>
    %75 = math.absf %74 : vector<8x64xf32>
    %cst_26 = arith.constant 0.327591091 : f32
    %76 = vector.broadcast %cst_26 : f32 to vector<8x64xf32>
    %77 = arith.mulf %76, %75 : vector<8x64xf32>
    %cst_27 = arith.constant 1.000000e+00 : f32
    %78 = vector.broadcast %cst_27 : f32 to vector<8x64xf32>
    %79 = arith.addf %78, %77 : vector<8x64xf32>
    %cst_28 = arith.constant 1.000000e+00 : f32
    %80 = vector.broadcast %cst_28 : f32 to vector<8x64xf32>
    %81 = arith.divf %80, %79 : vector<8x64xf32>
    %cst_29 = arith.constant 1.06140542 : f32
    %82 = vector.broadcast %cst_29 : f32 to vector<8x64xf32>
    %83 = arith.mulf %82, %81 : vector<8x64xf32>
    %cst_30 = arith.constant -1.45315206 : f32
    %84 = vector.broadcast %cst_30 : f32 to vector<8x64xf32>
    %85 = arith.addf %83, %84 : vector<8x64xf32>
    %86 = arith.mulf %85, %81 : vector<8x64xf32>
    %cst_31 = arith.constant 1.42141378 : f32
    %87 = vector.broadcast %cst_31 : f32 to vector<8x64xf32>
    %88 = arith.addf %86, %87 : vector<8x64xf32>
    %89 = arith.mulf %88, %81 : vector<8x64xf32>
    %cst_32 = arith.constant -0.284496725 : f32
    %90 = vector.broadcast %cst_32 : f32 to vector<8x64xf32>
    %91 = arith.addf %89, %90 : vector<8x64xf32>
    %92 = arith.mulf %91, %81 : vector<8x64xf32>
    %cst_33 = arith.constant 0.254829586 : f32
    %93 = vector.broadcast %cst_33 : f32 to vector<8x64xf32>
    %94 = arith.addf %92, %93 : vector<8x64xf32>
    %95 = arith.mulf %94, %81 : vector<8x64xf32>
    %cst_34 = arith.constant 0.000000e+00 : f32
    %96 = vector.broadcast %cst_34 : f32 to vector<8x64xf32>
    %97 = arith.subf %96, %75 : vector<8x64xf32>
    %98 = arith.mulf %97, %75 : vector<8x64xf32>
    %99 = math.exp %98 : vector<8x64xf32>
    %100 = arith.mulf %95, %99 : vector<8x64xf32>
    %cst_35 = arith.constant 1.000000e+00 : f32
    %101 = vector.broadcast %cst_35 : f32 to vector<8x64xf32>
    %102 = arith.subf %101, %100 : vector<8x64xf32>
    %cst_36 = arith.constant 0.000000e+00 : f32
    %103 = vector.broadcast %cst_36 : f32 to vector<8x64xf32>
    %104 = arith.cmpf oge, %74, %103 : vector<8x64xf32>
    %cst_37 = arith.constant 0.000000e+00 : f32
    %105 = vector.broadcast %cst_37 : f32 to vector<8x64xf32>
    %106 = arith.subf %105, %102 : vector<8x64xf32>
    %107 = arith.select %104, %102, %106 : vector<8x64xi1>, vector<8x64xf32>
    %cst_38 = arith.constant 1.000000e+00 : f32
    %108 = vector.broadcast %cst_38 : f32 to vector<8x64xf32>
    %109 = arith.addf %108, %107 : vector<8x64xf32>
    %110 = arith.mulf %72, %109 : vector<8x64xf32>
    %cst_39 = arith.constant dense<0.000000e+00> : vector<16x64xf32>
    %111 = tpu.matmul %2, %110, %cst_39 {dimension_numbers = #tpu.dot_dimension_numbers<[1], [0], [0], [1], [0, 0, 1, 1], [], []>, precision = #tpu.contract_precision<fp32>} : vector<16x8xf32>, vector<8x64xf32>, vector<16x64xf32> -> vector<16x64xf32>
    %112 = vector.broadcast %5 : vector<16x1xf32> to vector<16x64xf32>
    %113 = arith.addf %111, %112 : vector<16x64xf32>
    %cst_40 = arith.constant dense<0.000000e+00> : vector<64xf32>
    %114 = vector.multi_reduction <add>, %113, %cst_40 [0] : vector<16x64xf32> to vector<64xf32>
    %115 = vector.shape_cast %114 : vector<64xf32> to vector<1x64xf32>
    %116 = arith.mulf %113, %113 : vector<16x64xf32>
    %cst_41 = arith.constant dense<0.000000e+00> : vector<64xf32>
    %117 = vector.multi_reduction <add>, %116, %cst_41 [0] : vector<16x64xf32> to vector<64xf32>
    %118 = vector.shape_cast %117 : vector<64xf32> to vector<1x64xf32>
    %119 = vector.shape_cast %115 : vector<1x64xf32> to vector<1x1x64xf32>
    %cst_42 = arith.constant dense<0.000000e+00> : vector<1xf32>
    %120 = vector.multi_reduction <add>, %119, %cst_42 [1, 2] : vector<1x1x64xf32> to vector<1xf32>
    %121 = vector.shape_cast %120 : vector<1xf32> to vector<1x1x1xf32>
    %122 = vector.extract %121[0, 0, 0] : f32 from vector<1x1x1xf32>
    %123 = vector.broadcast %122 : f32 to vector<1x1xf32>
    %124 = vector.shape_cast %118 : vector<1x64xf32> to vector<1x1x64xf32>
    %cst_43 = arith.constant dense<0.000000e+00> : vector<1xf32>
    %125 = vector.multi_reduction <add>, %124, %cst_43 [1, 2] : vector<1x1x64xf32> to vector<1xf32>
    %126 = vector.shape_cast %125 : vector<1xf32> to vector<1x1x1xf32>
    %127 = vector.extract %126[0, 0, 0] : f32 from vector<1x1x1xf32>
    %128 = vector.broadcast %127 : f32 to vector<1x1xf32>
    %cst_44 = arith.constant 0.000000e+00 : f32
    %129 = vector.broadcast %cst_44 : f32 to vector<1x64xf32>
    %130 = arith.select %11, %115, %129 : vector<1x64xi1>, vector<1x64xf32>
    %131 = vector.shape_cast %130 : vector<1x64xf32> to vector<1x1x64xf32>
    %cst_45 = arith.constant dense<0.000000e+00> : vector<1xf32>
    %132 = vector.multi_reduction <add>, %131, %cst_45 [1, 2] : vector<1x1x64xf32> to vector<1xf32>
    %133 = vector.shape_cast %132 : vector<1xf32> to vector<1x1x1xf32>
    %134 = vector.extract %133[0, 0, 0] : f32 from vector<1x1x1xf32>
    %135 = vector.broadcast %134 : f32 to vector<1x1xf32>
    %cst_46 = arith.constant 0.000000e+00 : f32
    %136 = vector.broadcast %cst_46 : f32 to vector<1x64xf32>
    %137 = arith.select %11, %118, %136 : vector<1x64xi1>, vector<1x64xf32>
    %138 = vector.shape_cast %137 : vector<1x64xf32> to vector<1x1x64xf32>
    %cst_47 = arith.constant dense<0.000000e+00> : vector<1xf32>
    %139 = vector.multi_reduction <add>, %138, %cst_47 [1, 2] : vector<1x1x64xf32> to vector<1xf32>
    %140 = vector.shape_cast %139 : vector<1xf32> to vector<1x1x1xf32>
    %141 = vector.extract %140[0, 0, 0] : f32 from vector<1x1x1xf32>
    %142 = vector.broadcast %141 : f32 to vector<1x1xf32>
    %143 = arith.subf %123, %135 : vector<1x1xf32>
    %144 = vector.shape_cast %135 : vector<1x1xf32> to vector<1x1xf32>
    %145 = vector.broadcast %144 : vector<1x1xf32> to vector<1x64xf32>
    %146 = vector.shape_cast %143 : vector<1x1xf32> to vector<1x1xf32>
    %147 = vector.broadcast %146 : vector<1x1xf32> to vector<1x64xf32>
    %148 = arith.select %11, %145, %147 : vector<1x64xi1>, vector<1x64xf32>
    %cst_48 = arith.constant 0.001953125 : f32
    %149 = vector.broadcast %cst_48 : f32 to vector<1x64xf32>
    %150 = arith.mulf %148, %149 : vector<1x64xf32>
    %151 = arith.subf %128, %142 : vector<1x1xf32>
    %152 = vector.shape_cast %142 : vector<1x1xf32> to vector<1x1xf32>
    %153 = vector.broadcast %152 : vector<1x1xf32> to vector<1x64xf32>
    %154 = vector.shape_cast %151 : vector<1x1xf32> to vector<1x1xf32>
    %155 = vector.broadcast %154 : vector<1x1xf32> to vector<1x64xf32>
    %156 = arith.select %11, %153, %155 : vector<1x64xi1>, vector<1x64xf32>
    %cst_49 = arith.constant 0.001953125 : f32
    %157 = vector.broadcast %cst_49 : f32 to vector<1x64xf32>
    %158 = arith.mulf %156, %157 : vector<1x64xf32>
    %159 = arith.mulf %150, %150 : vector<1x64xf32>
    %160 = arith.subf %158, %159 : vector<1x64xf32>
    %cst_50 = arith.constant 9.99999974E-6 : f32
    %161 = vector.broadcast %cst_50 : f32 to vector<1x64xf32>
    %162 = arith.addf %160, %161 : vector<1x64xf32>
    %163 = math.rsqrt %162 : vector<1x64xf32>
    %164 = vector.broadcast %6 : vector<16x1xf32> to vector<16x64xf32>
    %165 = vector.broadcast %163 : vector<1x64xf32> to vector<16x64xf32>
    %166 = arith.mulf %164, %165 : vector<16x64xf32>
    %167 = vector.broadcast %150 : vector<1x64xf32> to vector<16x64xf32>
    %168 = arith.mulf %167, %166 : vector<16x64xf32>
    %169 = vector.broadcast %7 : vector<16x1xf32> to vector<16x64xf32>
    %170 = arith.subf %169, %168 : vector<16x64xf32>
    %171 = arith.mulf %113, %166 : vector<16x64xf32>
    %172 = arith.addf %171, %170 : vector<16x64xf32>
    %173 = vector.extract_strided_slice %172 {offsets = [0, 0], sizes = [8, 64], strides = [1, 1]} : vector<16x64xf32> to vector<8x64xf32>
    %174 = vector.extract_strided_slice %172 {offsets = [8, 0], sizes = [8, 64], strides = [1, 1]} : vector<16x64xf32> to vector<8x64xf32>
    %175 = arith.negf %174 : vector<8x64xf32>
    %176 = math.exp %175 : vector<8x64xf32>
    %cst_51 = arith.constant 1.000000e+00 : f32
    %177 = vector.broadcast %cst_51 : f32 to vector<8x64xf32>
    %178 = arith.addf %177, %176 : vector<8x64xf32>
    %179 = arith.divf %177, %178 : vector<8x64xf32>
    %180 = arith.mulf %173, %179 : vector<8x64xf32>
    %c0_52 = arith.constant 0 : index
    %c0_53 = arith.constant 0 : index
    %181 = vector.load %arg5[%c0_52, %c0_53] : memref<8x64xf32, #tpu.memory_space<vmem>>, vector<8x64xf32>
    tpu.vector_store %arg5[%c0_52, %c0_53], %180 {strides = array<i32>} : memref<8x64xf32, #tpu.memory_space<vmem>>, vector<8x64xf32>,
    return
  }
}

</mosaic_0001>

<bundles_post_ra>
// kernel: tpu_custom_call.1
= control target key start
LH: loop header
LB: loop body
LE: loop exit
PB: predicated region body
PF: predicated region fallthrough
CT: control target
= control target key end

     0   :  { %vm36_vm0 = vcmask 1040384   ;;  %v1570_v3 = vmov 0.0|0.0   ;;  %vm32_vm1 = vcmask 269312   ;;  %vm1571_vm2 = vmmov 0   ;;  %s1785_s0 = inlined_call_operand.vmem [shape: f32[33,64], index: 0, kind: input, shape index: {}]   ;;  %s1786_s1 = inlined_call_operand.vmem [shape: f32[8,33], index: 1, kind: input, shape index: {}]   ;;  %s1787_s2 = inlined_call_operand.vmem [shape: f32[8,2], index: 2, kind: input, shape index: {}]   ;;  %s1788_s3 = inlined_call_operand.vmem [shape: f32[16,8], index: 3, kind: input, shape index: {}]   ;;  %s1789_s4 = inlined_call_operand.vmem [shape: f32[16,3], index: 4, kind: input, shape index: {}]   ;;  %s1790_s5 = inlined_call_operand.hbm [shape: f32[8,64], index: 5, kind: output, shape index: {}]  }
   0x1   :  { %v21_v0 = vld [vmem:[%s1785_s0] sm:$0xff]  ;;  %v22_v1 = vld [vmem:[%s1785_s0 + $0x8] sm:$0xff]  ;;  %v23_v2 = vld [vmem:[%s1785_s0 + $0x10] sm:$0xff]  ;;  %1460 = vmatprep.subr.bf16.mxu0 %v1570_v3  ;;  %1448 = vmatprep.subr.bf16.mxu1 %v1570_v3  ;;  %v1572_v15 = vmov 0.0  }
   0x2   :  { %v41_v4 = vand.u32 4294901760, %v21_v0  ;;  %v44_v5 = vand.u32 4294901760, %v22_v1  ;;  %v24_v6 = vld [vmem:[%s1785_s0 + $0x18] sm:$0xff]  ;;  %v47_v7 = vand.u32 4294901760, %v23_v2  ;;  %v25_v8 = vld [vmem:[%s1785_s0 + $0x20] sm:$0x1]  ;;  %1376 = vmatprep.mubr.msk.f32.mxu0 %vm1571_vm2, %v1572_v15  ;;  %1350 = vmatprep.mubr.msk.f32.mxu1 %vm1571_vm2, %v1572_v15 }
   0x3   :  { %v50_v9 = vand.u32 4294901760, %v24_v6  ;;  %v26_v10 = vld [vmem:[%s1786_s1] sm:$0xff]  ;;  %v38_v14 = vsel %vm36_vm0, %v25_v8, 0 }
   0x4   :  { %v122_v11 = vsub.f32 %v21_v0, %v41_v4  ;;  %v129_v12 = vsub.f32 %v22_v1, %v44_v5  ;;  %v1627_v13 = vsub.f32 %v23_v2, %v47_v7 }
   0x5   :  { %10 = vsyncpa [#allocation3], 0  ;;  %v143_v16 = vsub.f32 %v24_v6, %v50_v9  ;;  %v1633_v17 = vpack.c.bf16 %v44_v5, %v41_v4  ;;  %v34_v18 = vsel %vm32_vm1, %v26_v10, 0  ;;  %v1636_v23 = vand.u32 4294901760, %v38_v14  ;;  %s1576_s18 = smov [#allocation2]  }
   0x6   :  { %v123_v19 = vand.u32 4294901760, %v122_v11  ;;  %v130_v20 = vand.u32 4294901760, %v129_v12  ;;  %v1461_v21 = vpack.c.bf16 %v129_v12, %v122_v11  ;;  %v1639_v24 = vand.u32 4294901760, %v34_v18  ;;  %s1277_s19 = sshll.u32 %s1576_s18, 4  ;;  %s1278_s19 = int_to_ptr.vmem [resolvable:$true] %s1277_s19 }
   0x7   :  { %v1464_v22 = vpack.c.bf16 %v143_v16, %v1627_v13  ;;  %1450 = vmatpush3.bf16.msra.mxu1 %v1633_v17  ;;  %v1452_v25 = vpack.c.bf16 %v50_v9, %v47_v7  ;;  %v137_v28 = vand.u32 4294901760, %v1627_v13  ;;  %v144_v29 = vand.u32 4294901760, %v143_v16  ;;  %s1546_s20 = scalar_lea.vmem %s1278_s19, 128  ;;  %p1551_p1 = scmp.lt.s32.totalorder %s1278_s19, %s1278_s19 }
   0x8   :  { %1462 = vmatpush3.bf16.msra.mxu0 %v1461_v21  ;;  %1451 = vmatprep.subr.bf16.mxu1 %v1570_v3  ;;  %v124_v26 = vsub.f32 %v122_v11, %v123_v19  ;;  %v131_v27 = vsub.f32 %v129_v12, %v130_v20  ;;  %v111_v30 = vsub.f32 %v34_v18, %v1639_v24  ;;  %v1573_v48 = vmov 0   ;;  %p1547_p0 = scmp.ne.s32.totalorder %s1278_s19, %s1546_s20  ;;  %p1552_p2 = scmp.lt.s32.totalorder %s1546_s20, %s1546_s20 }
   0x9   :  { %1463 = vmatprep.subr.bf16.mxu0 %v1570_v3  ;;  %v150_v31 = vsub.f32 %v38_v14, %v1636_v23  ;;  %v138_v35 = vsub.f32 %v1627_v13, %v137_v28  ;;  %v145_v36 = vsub.f32 %v143_v16, %v144_v29  ;;  %v1473_v45 = vpack.c.bf16 %v130_v20, %v123_v19  ;;  %v29_v14 = vld [vmem:[%s1787_s2] sm:$0xff] }
   0xa   :  { %v112_v32 = vand.u32 4294901760, %v111_v30  ;;  %v125_v33 = vand.u32 4294901760, %v124_v26  ;;  %v132_v34 = vand.u32 4294901760, %v131_v27  ;;  %v1476_v47 = vpack.c.bf16 %v144_v29, %v137_v28  ;;  %1528 = vset.pattern.permute.xlu0 %v1573_v48  ;;  %p1553_p3 = por %p1552_p2, %p1551_p1 }
   0xb   :  { %1453 = vmatpush3.bf16.msra.mxu1 %v1452_v25  ;;  %v151_v39 = vand.u32 4294901760, %v150_v31  ;;  %v139_v41 = vand.u32 4294901760, %v138_v35  ;;  %v146_v42 = vand.u32 4294901760, %v145_v36  ;;  %v1574_v49 = vmov 1  }
   0xc   :  { %1465 = vmatpush3.bf16.msra.mxu0 %v1464_v22  ;;  %1348 = vmatprep.subr.mxu1 %v1572_v15  ;;  %v113_v37 = vsub.f32 %v111_v30, %v112_v32  ;;  %v1455_v40 = vpack.c.bf16 %v132_v34, %v125_v33  ;;  %vm541_vm3 = vcmask 523264   ;;  %v538_v59 = vlaneseq  ;;  %v27_v34 = vld [vmem:[%s1788_s3] sm:$0xff]  ;;  %p1554_p4 = pnand %p1553_p3, %p1547_p0 }
   0xd   :  { %1374 = vmatprep.subr.mxu0 %v1572_v15  ;;  %v1458_v43 = vpack.c.bf16 %v146_v42, %v139_v41  ;;  %v152_v44 = vsub.f32 %v150_v31, %v151_v39  ;;  %1529 = vset.pattern.permute.xlu1 %v1574_v49  ;;  %vm557_vm4 = vcmask 516096   ;;  %vm665_vm6 = vcmask 64512  }
   0xe   :  { %v114_v38 = vand.u32 4294901760, %v113_v37  ;;  %v1685_v0 = vand.u32 127, %v538_v59  ;;  %v667_v37 = vsel %vm665_vm6, %v27_v34, 0 }
   0xf   :  { %1349 = vmatpush3.msra.mxu1 %v1636_v23  ;;  %v153_v46 = vand.u32 4294901760, %v152_v44 }
  0x10   :  { %1375 = vmatpush3.msra.mxu0 %v150_v31  ;;  %1454 = vmatprep.subr.bf16.mxu1 %v1570_v3  ;;  %vm540_vm5 = vcmp.lt.s32.totalorder %v1685_v0, 32 }
  0x11   :  { %1466 = vmatprep.subr.bf16.mxu0 %v1570_v3  ;;  %1377 = vmatmul.mubr.f32.vlgmr.msra.gmra.mrb[0].mxu0 %v111_v30 }
  0x12   :  { %1468 = vmatpush3.bf16.msra.mxu0 %v1633_v17  ;;  %1389 = vmatprep.mubr.msk.f32.mxu0 %vm1571_vm2, %v1572_v15 }
  0x13   :  { %1469 = vmatprep.subr.bf16.mxu0 %v1570_v3  ;;  %1351 = vmatmul.mubr.f32.vlgmr.msra.gmra.mrb[0].mxu1 %v114_v38 }
  0x14   :  { %1456 = vmatpush3.bf16.msra.mxu1 %v1455_v40  ;;  %1363 = vmatprep.mubr.msk.f32.mxu1 %vm1571_vm2, %v1572_v15  ;;  %v1703_v40 = vand.u32 4294901760, %v667_v37 }
  0x15   :  { %1457 = vmatprep.subr.bf16.mxu1 %v1570_v3 }
  0x16   :  { %1471 = vmatpush3.bf16.msra.mxu0 %v1452_v25 }
  0x17   :  { %1387 = vmatprep.subr.mxu0 %v1572_v15 }
  0x18   :  { %1459 = vmatpush3.bf16.msra.mxu1 %v1458_v43  ;;  %v1706_v43 = vsub.f32 %v667_v37, %v1703_v40 }
  0x19   :  { %1361 = vmatprep.subr.mxu1 %v1572_v15 }
  0x1a   :  { %1388 = vmatpush3.msra.mxu0 %v1636_v23 }
  0x1b   :  { %1472 = vmatprep.subr.bf16.mxu0 %v1570_v3  ;;  %1390 = vmatmul.mubr.f32.vlgmr.msra.gmra.mrb[0].mxu0 %v112_v32 }
  0x1c   :  { %1474 = vmatpush3.bf16.msra.mxu0 %v1473_v45  ;;  %1362 = vmatpush3.msra.mxu1 %v153_v46 }
  0x1d   :  { %1475 = vmatprep.subr.bf16.mxu0 %v1570_v3  ;;  %1364 = vmatmul.mubr.f32.vlgmr.msra.gmra.mrb[0].mxu1 %v1639_v24 }
  0x1e   :  { %1402 = vmatprep.mubr.msk.f32.mxu0 %vm1571_vm2, %v1572_v15 }
  0x20   :  { %1477 = vmatpush3.bf16.msra.mxu0 %v1476_v47  ;;  %v740_v47 = vand.u32 4294901760, %v1706_v43 }
  0x21   :  { %1400 = vmatprep.subr.mxu0 %v1572_v15 }
  0x24   :  { %1401 = vmatpush3.msra.mxu0 %v151_v39 }
  0x25   :  { %1478 = vmatprep.subr.bf16.mxu0 %v1570_v3  ;;  %1403 = vmatmul.mubr.f32.vlgmr.msra.gmra.mrb[0].mxu0 %v1639_v24 }
  0x26   :  { %1480 = vmatpush3.bf16.msra.mxu0 %v1633_v17  ;;  %1415 = vmatprep.mubr.msk.f32.mxu0 %vm1571_vm2, %v1572_v15 }
  0x27   :  { %1481 = vmatprep.subr.bf16.mxu0 %v1570_v3 }
  0x2a   :  { %1483 = vmatpush3.bf16.msra.mxu0 %v1452_v25 }
  0x2b   :  { %1413 = vmatprep.subr.mxu0 %v1572_v15 }
  0x2e   :  { %1414 = vmatpush3.msra.mxu0 %v1636_v23 }
  0x2f   :  { %1416 = vmatmul.mubr.f32.vlgmr.msra.gmra.mrb[0].mxu0 %v1639_v24 }
  0xf0   :  { %v212_v50 = vpop.f32.mrb[0].mxu1 }
  0xf1   :  { %v1365_v51 = vpop.f32.mrb[1].mxu1 }
  0xf2   :  { %v1715_v51 = vld [vmem:[%s1789_s4] sm:$0xff] }
 0x102   :  { %v534_v52 = vpop.f32.mrb[0].mxu0 }
 0x103   :  { %v1678_v53 = vadd.f32 %v534_v52, %v212_v50  ;;  %v1417_v54 = vpop.f32.mrb[1].mxu0  ;;  %v1721_v52 = vld [vmem:[%s1789_s4 + $0x8] sm:$0xff] }
 0x105   :  { %v542_v55 = vsel %vm541_vm3, %v1678_v53, 0.0  ;;  %v549_v56 = vmul.f32 %v1678_v53, %v1678_v53 }
 0x106   :  { %v543_v57 = vrot.slane %v542_v55, 4 }
 0x107   :  { %v550_v58 = vsel %vm541_vm3, %v549_v56, 0.0 }
 0x108   :  { %v551_v60 = vrot.slane %v550_v58, 4  ;;  %v544_v61 = vadd.f32 %v543_v57, %v542_v55 }
 0x10a   :  { %v545_v62 = vrot.slane %v544_v61, 2  ;;  %v552_v63 = vadd.f32 %v551_v60, %v550_v58 }
 0x10c   :  { %v546_v1 = vadd.f32 %v545_v62, %v544_v61  ;;  %v553_v2 = vrot.slane %v552_v63, 2 }
 0x10e   :  { %v547_v3 = vrot.slane %v546_v1, 1  ;;  %v554_v4 = vadd.f32 %v553_v2, %v552_v63 }
 0x110   :  { %v548_v5 = vadd.f32 %v547_v3, %v546_v1  ;;  %v555_v6 = vrot.slane %v554_v4, 1 }
 0x112   :  { %v558_v7 = vsel %vm557_vm4, %v548_v5, 0.0  ;;  %v580_v8 = vsel %vm540_vm5, %v548_v5, 0.0  ;;  %v556_v9 = vadd.f32 %v555_v6, %v554_v4 }
 0x113   :  { %559 = vadd.xlane.f32.xlu0 %v558_v7  ;;  %v581_v10 = vsel %vm557_vm4, %v580_v8, 0.0 }
 0x114   :  { %582 = vadd.xlane.f32.xlu1 %v581_v10  ;;  %v592_v11 = vsel %vm540_vm5, %v556_v9, 0.0  ;;  %v569_v12 = vsel %vm557_vm4, %v556_v9, 0.0 }
 0x115   :  { %v593_v13 = vsel %vm557_vm4, %v592_v11, 0.0 }
 0x117   :  { %570 = vadd.xlane.f32.xlu0 %v569_v12 }
 0x118   :  { %594 = vadd.xlane.f32.xlu1 %v593_v13 }
 0x129   :  { %622 = vperm.xlu1 %1529, %v29_v14  }
 0x12d   :  { %616 = vperm.xlu0 %1528, %v29_v14   ;;  %1530 = vset.pattern.permute.xlu1 %v1573_v48  ;;  %v741_v48 = vsub.f32 %v1706_v43, %v740_v47 }
 0x12e   :  { %657 = vperm.xlu1 %1530, %v1715_v51  }
 0x12f   :  { %v742_v50 = vand.u32 4294901760, %v741_v48 }
 0x131   :  { %1420 = vmatprep.mubr.f32.mxu1 %v742_v50 }
 0x132   :  { %662 = vperm.xlu1 %1530, %v1721_v52  }
 0x136   :  { %1531 = vset.pattern.permute.xlu1 %v1574_v49 }
 0x1a0   :  { %v560_v15 = vpop.xlane.xlu0 %559 }
 0x1a1   :  { %v561_v16 = vrot.slane %v560_v15, 4  ;;  %v583_v17 = vpop.xlane.xlu1 %582 }
 0x1a2   :  { %v584_v18 = vrot.slane %v583_v17, 4 }
 0x1a3   :  { %v562_v19 = vadd.f32 %v561_v16, %v560_v15 }
 0x1a4   :  { %v585_v20 = vadd.f32 %v584_v18, %v583_v17  ;;  %v571_v21 = vpop.xlane.xlu0 %570 }
 0x1a5   :  { %v563_v22 = vrot.slane %v562_v19, 2  ;;  %v572_v23 = vrot.slane %v571_v21, 4  ;;  %v595_v24 = vpop.xlane.xlu1 %594 }
 0x1a6   :  { %v586_v25 = vrot.slane %v585_v20, 2  ;;  %v596_v26 = vrot.slane %v595_v24, 4 }
 0x1a7   :  { %v573_v27 = vadd.f32 %v572_v23, %v571_v21  ;;  %v564_v28 = vadd.f32 %v563_v22, %v562_v19 }
 0x1a8   :  { %v597_v29 = vadd.f32 %v596_v26, %v595_v24  ;;  %v587_v30 = vadd.f32 %v586_v25, %v585_v20 }
 0x1a9   :  { %v574_v31 = vrot.slane %v573_v27, 2  ;;  %v565_v32 = vrot.slane %v564_v28, 1  ;;  %v623_v7 = vpop.permute.xlu1 %622 }
 0x1aa   :  { %v598_v33 = vrot.slane %v597_v29, 2  ;;  %v588_v38 = vrot.slane %v587_v30, 1 }
 0x1ab   :  { %v566_v35 = vadd.f32 %v565_v32, %v564_v28  ;;  %v575_v36 = vadd.f32 %v574_v31, %v573_v27 }
 0x1ac   :  { %v599_v39 = vadd.f32 %v598_v33, %v597_v29  ;;  %v589_v45 = vadd.f32 %v588_v38, %v587_v30  ;;  %v617_v4 = vpop.permute.xlu0 %616 }
 0x1ad   :  { %1505 = vpush %v566_v35  ;;  %v576_v41 = vrot.slane %v575_v36, 1 }
 0x1ae   :  { %v600_v42 = vrot.slane %v599_v39, 1 }
 0x1af   :  { %v577_v44 = vadd.f32 %v576_v41, %v575_v36 }
 0x1b0   :  { %v601_v46 = vadd.f32 %v600_v42, %v599_v39 }
 0x1b1   :  { %1507 = vpush %v577_v44 }
 0x1b2   :  { %1509 = vpush %v589_v45 }
 0x1b3   :  { %1511 = vpush %v601_v46 }
 0x1de   :  { %s1506_s8 = spop %1505 }
 0x1df   :  { %v568_v55 = vstv %s1506_s8 }
 0x1e2   :  { %s1508_s11 = spop %1507 }
 0x1e3   :  { %v579_v54 = vstv %s1508_s11  ;;  %s1510_s12 = spop %1509 }
 0x1e4   :  { %v591_v56 = vstv %s1510_s12  ;;  %s1512_s13 = spop %1511 }
 0x1e5   :  { %v604_v57 = vsub.f32 %v568_v55, %v591_v56  ;;  %v603_v58 = vstv %s1512_s13  ;;  %v658_v55 = vpop.permute.xlu1 %657 }
 0x1e6   :  { %v607_v59 = vsub.f32 %v579_v54, %v603_v58  ;;  %v1575_v54 = vmov 2  }
 0x1e7   :  { %v605_v60 = vsel %vm540_vm5, %v591_v56, %v604_v57  ;;  %1532 = vset.pattern.permute.xlu0 %v1575_v54 }
 0x1e8   :  { %v606_v61 = vmul.f32 0.00390625, %v605_v60  ;;  %v608_v62 = vsel %vm540_vm5, %v603_v58, %v607_v59 }
 0x1e9   :  { %v609_v63 = vmul.f32 0.00390625, %v608_v62  ;;  %v663_v56 = vpop.permute.xlu1 %662 }
 0x1ea   :  { %v610_v1 = vmul.f32 %v606_v61, %v606_v61 }
 0x1ec   :  { %v611_v2 = vsub.f32 %v609_v63, %v610_v1 }
 0x1ee   :  { %v612_v3 = vadd.f32 1e-05, %v611_v2 }
 0x1f0   :  { %1534 = vrsqrt.f32 %v612_v3 }
 0x1fa   :  { %v1535_v5 = vpop.eup %1534 }
 0x1fb   :  { %v619_v6 = vmul.f32 %v1535_v5, %v617_v4 }
 0x1fd   :  { %v620_v8 = vmul.f32 %v619_v6, %v606_v61  ;;  %v626_v9 = vmul.f32 %v1678_v53, %v619_v6  ;;  %v28_v53 = vld [vmem:[%s1788_s3 + $0x8] sm:$0xff] }
 0x1fe   :  { %v670_v25 = vsel %vm665_vm6, %v28_v53, 0 }
 0x1ff   :  { %v625_v10 = vsub.f32 %v623_v7, %v620_v8  ;;  %v748_v27 = vand.u32 4294901760, %v670_v25 }
 0x201   :  { %v627_v11 = vadd.f32 %v626_v9, %v625_v10  ;;  %v749_v31 = vsub.f32 %v670_v25, %v748_v27 }
 0x203   :  { %v629_v12 = vmul.f32 0.70710677, %v627_v11  ;;  %v750_v34 = vand.u32 4294901760, %v749_v31  ;;  %v628_v37 = vmul.f32 0.5, %v627_v11 }
 0x205   :  { %v630_v13 = vand.u32 2147483647, %v629_v12  ;;  %vm650_vm7 = vcmp.ge.f32.partialorder %v629_v12, 0.0  ;;  %v751_v39 = vsub.f32 %v749_v31, %v750_v34 }
 0x207   :  { %v631_v14 = vmul.f32 0.3275911, %v630_v13  ;;  %v644_v49 = vsub.f32 0.0, %v630_v13  ;;  %v752_v44 = vand.u32 4294901760, %v751_v39 }
 0x209   :  { %v632_v15 = vadd.f32 1.0, %v631_v14  ;;  %v645_v17 = vmul.f32 %v644_v49, %v630_v13 }
 0x20b   :  { %1536 = vrcp.f32 %v632_v15  ;;  %v646_v20 = vmul.f32 1.442695, %v645_v17 }
 0x20d   :  { %1538 = vpow2.f32 %v646_v20 }
 0x215   :  { %v1537_v16 = vpop.eup %1536 }
 0x216   :  { %v635_v18 = vmul.f32 1.0614054, %v1537_v16 }
 0x217   :  { %v1539_v30 = vpop.eup %1538 }
 0x218   :  { %v636_v19 = vadd.f32 -1.4531521, %v635_v18 }
 0x21a   :  { %v637_v21 = vmul.f32 %v1537_v16, %v636_v19 }
 0x21c   :  { %v638_v22 = vadd.f32 1.4214138, %v637_v21 }
 0x21e   :  { %v639_v23 = vmul.f32 %v1537_v16, %v638_v22 }
 0x220   :  { %v640_v24 = vadd.f32 -0.28449672, %v639_v23 }
 0x222   :  { %v641_v26 = vmul.f32 %v1537_v16, %v640_v24 }
 0x224   :  { %v642_v28 = vadd.f32 0.2548296, %v641_v26 }
 0x226   :  { %v643_v29 = vmul.f32 %v1537_v16, %v642_v28 }
 0x228   :  { %v648_v32 = vmul.f32 %v1539_v30, %v643_v29 }
 0x22a   :  { %v649_v33 = vsub.f32 1.0, %v648_v32 }
 0x22c   :  { %v651_v35 = vsub.f32 0.0, %v649_v33 }
 0x22e   :  { %v652_v36 = vsel %vm650_vm7, %v649_v33, %v651_v35 }
 0x22f   :  { %v653_v38 = vadd.f32 1.0, %v652_v36 }
 0x231   :  { %v654_v41 = vmul.f32 %v653_v38, %v628_v37 }
 0x233   :  { %v673_v42 = vand.u32 4294901760, %v654_v41 }
 0x235   :  { %v760_v45 = vsub.f32 %v654_v41, %v673_v42  ;;  %1418 = vmatprep.subr.mxu1 %v673_v42 }
 0x236   :  { %1419 = vmatpush3.msra.mxu1 %v673_v42 }
 0x237   :  { %1421 = vmatmul.mubr.f32.vlgmr.msra.gmra.mrb[2].mxu1 %v752_v44  ;;  %v761_v46 = vand.u32 4294901760, %v760_v45 }
 0x238   :  { %1425 = vmatprep.mubr.f32.mxu1 %v1703_v40 }
 0x239   :  { %v762_v48 = vsub.f32 %v760_v45, %v761_v46 }
 0x23b   :  { %v763_v50 = vand.u32 4294901760, %v762_v48 }
 0x23d   :  { %1423 = vmatprep.subr.mxu1 %v763_v50 }
 0x23e   :  { %1424 = vmatpush3.msra.mxu1 %v763_v50 }
 0x23f   :  { %1426 = vmatmul.mubr.f32.vlgmr.msra.gmra.mrb[2].mxu1 %v748_v27  ;;  %1428 = vmatprep.subr.mxu1 %v760_v45 }
 0x240   :  { %1429 = vmatpush3.msra.mxu1 %v760_v45  ;;  %1430 = vmatprep.mubr.f32.mxu1 %v1706_v43 }
 0x241   :  { %1433 = vmatprep.subr.mxu1 %v673_v42 }
 0x247   :  { %1431 = vmatmul.mubr.f32.vlgmr.msra.gmra.mrb[2].mxu1 %v749_v31 }
 0x248   :  { %1434 = vmatpush3.msra.mxu1 %v673_v42  ;;  %1435 = vmatprep.mubr.f32.mxu1 %v740_v47 }
 0x249   :  { %1438 = vmatprep.subr.mxu1 %v761_v46 }
 0x24f   :  { %1436 = vmatmul.mubr.f32.vlgmr.msra.gmra.mrb[2].mxu1 %v750_v34 }
 0x250   :  { %1439 = vmatpush3.msra.mxu1 %v761_v46  ;;  %1440 = vmatprep.mubr.f32.mxu1 %v1703_v40 }
 0x251   :  { %1443 = vmatprep.subr.mxu1 %v673_v42 }
 0x257   :  { %1441 = vmatmul.mubr.f32.vlgmr.msra.gmra.mrb[2].mxu1 %v748_v27 }
 0x258   :  { %1444 = vmatpush3.msra.mxu1 %v673_v42  ;;  %1445 = vmatprep.mubr.f32.mxu1 %v1703_v40 }
 0x25f   :  { %1446 = vmatmul.mubr.f32.vlgmr.msra.gmra.mrb[2].mxu1 %v748_v27 }
 0x332   :  { %v1447_v57 = vpop.f32.mrb[2].mxu1 }
 0x333   :  { %v1740_v58 = vadd.f32 %v1447_v57, %v663_v56  ;;  %v1151_v43 = vpop.f32.mrb[3].mxu1 }
 0x334   :  { %v1742_v47 = vadd.f32 %v1151_v43, %v658_v55 }
 0x335   :  { %v1162_v59 = vsel %vm541_vm3, %v1740_v58, 0.0  ;;  %v1171_v60 = vmul.f32 %v1740_v58, %v1740_v58 }
 0x336   :  { %v1161_v40 = vsel %vm541_vm3, %v1742_v47, 0.0  ;;  %v1170_v61 = vmul.f32 %v1742_v47, %v1742_v47 }
 0x337   :  { %v1173_v62 = vsel %vm541_vm3, %v1171_v60, 0.0  ;;  %v1163_v63 = vadd.f32 %v1162_v59, %v1161_v40 }
 0x338   :  { %v1172_v1 = vsel %vm541_vm3, %v1170_v61, 0.0 }
 0x339   :  { %v1164_v2 = vrot.slane %v1163_v63, 4  ;;  %v1174_v3 = vadd.f32 %v1173_v62, %v1172_v1 }
 0x33b   :  { %v1165_v4 = vadd.f32 %v1164_v2, %v1163_v63  ;;  %v1175_v5 = vrot.slane %v1174_v3, 4 }
 0x33d   :  { %v1166_v6 = vrot.slane %v1165_v4, 2  ;;  %v1176_v7 = vadd.f32 %v1175_v5, %v1174_v3 }
 0x33f   :  { %v1167_v8 = vadd.f32 %v1166_v6, %v1165_v4  ;;  %v1177_v9 = vrot.slane %v1176_v7, 2 }
 0x341   :  { %v1168_v10 = vrot.slane %v1167_v8, 1  ;;  %v1178_v11 = vadd.f32 %v1177_v9, %v1176_v7 }
 0x343   :  { %v1169_v12 = vadd.f32 %v1168_v10, %v1167_v8  ;;  %v1179_v13 = vrot.slane %v1178_v11, 1 }
 0x345   :  { %v1181_v14 = vsel %vm557_vm4, %v1169_v12, 0.0  ;;  %v1180_v15 = vadd.f32 %v1179_v13, %v1178_v11  ;;  %v1203_v49 = vsel %vm540_vm5, %v1169_v12, 0.0 }
 0x346   :  { %1182 = vadd.xlane.f32.xlu1 %v1181_v14  ;;  %v1204_v17 = vsel %vm557_vm4, %v1203_v49, 0.0 }
 0x347   :  { %v1192_v16 = vsel %vm557_vm4, %v1180_v15, 0.0  ;;  %v1215_v18 = vsel %vm540_vm5, %v1180_v15, 0.0 }
 0x348   :  { %1193 = vadd.xlane.f32.xlu0 %v1192_v16  ;;  %v1216_v19 = vsel %vm557_vm4, %v1215_v18, 0.0 }
 0x34a   :  { %1205 = vadd.xlane.f32.xlu1 %v1204_v17 }
 0x34e   :  { %1217 = vadd.xlane.f32.xlu1 %v1216_v19 }
 0x35e   :  { %1254 = vperm.xlu0 %1532, %v1721_v52  }
 0x35f   :  { %1242 = vperm.xlu1 %1531, %v1721_v52  }
 0x363   :  { %1238 = vperm.xlu1 %1531, %v1715_v51  }
 0x367   :  { %1533 = vset.pattern.permute.xlu1 %v1575_v54 }
 0x368   :  { %1250 = vperm.xlu1 %1533, %v1715_v51  }
 0x3d3   :  { %v1183_v20 = vpop.xlane.xlu1 %1182 }
 0x3d4   :  { %v1184_v21 = vrot.slane %v1183_v20, 4 }
 0x3d5   :  { %v1194_v22 = vpop.xlane.xlu0 %1193 }
 0x3d6   :  { %v1185_v53 = vadd.f32 %v1184_v21, %v1183_v20  ;;  %v1195_v23 = vrot.slane %v1194_v22, 4 }
 0x3d7   :  { %v1206_v24 = vpop.xlane.xlu1 %1205 }
 0x3d8   :  { %v1186_v25 = vrot.slane %v1185_v53, 2  ;;  %v1196_v26 = vadd.f32 %v1195_v23, %v1194_v22  ;;  %v1207_v27 = vrot.slane %v1206_v24, 4 }
 0x3da   :  { %v1197_v28 = vrot.slane %v1196_v26, 2  ;;  %v1208_v29 = vadd.f32 %v1207_v27, %v1206_v24  ;;  %v1187_v30 = vadd.f32 %v1186_v25, %v1185_v53 }
 0x3db   :  { %v1218_v31 = vpop.xlane.xlu1 %1217 }
 0x3dc   :  { %v1209_v32 = vrot.slane %v1208_v29, 2  ;;  %v1219_v52 = vrot.slane %v1218_v31, 4  ;;  %v1188_v33 = vrot.slane %v1187_v30, 1  ;;  %v1198_v34 = vadd.f32 %v1197_v28, %v1196_v26 }
 0x3dd   :  { %v1255_v4 = vpop.permute.xlu0 %1254 }
 0x3de   :  { %v1220_v35 = vadd.f32 %v1219_v52, %v1218_v31  ;;  %v1189_v36 = vadd.f32 %v1188_v33, %v1187_v30  ;;  %v1199_v51 = vrot.slane %v1198_v34, 1  ;;  %v1210_v37 = vadd.f32 %v1209_v32, %v1208_v29 }
 0x3df   :  { %v1243_v2 = vpop.permute.xlu1 %1242 }
 0x3e0   :  { %v1221_v38 = vrot.slane %v1220_v35, 2  ;;  %1513 = vpush %v1189_v36  ;;  %v1200_v39 = vadd.f32 %v1199_v51, %v1198_v34  ;;  %v1211_v41 = vrot.slane %v1210_v37, 1 }
 0x3e2   :  { %1515 = vpush %v1200_v39  ;;  %v1212_v42 = vadd.f32 %v1211_v41, %v1210_v37  ;;  %v1222_v44 = vadd.f32 %v1221_v38, %v1220_v35 }
 0x3e3   :  { %v1239_v10 = vpop.permute.xlu1 %1238 }
 0x3e4   :  { %1517 = vpush %v1212_v42  ;;  %v1223_v45 = vrot.slane %v1222_v44, 1 }
 0x3e6   :  { %v1224_v46 = vadd.f32 %v1223_v45, %v1222_v44 }
 0x3e7   :  { %v1251_v14 = vpop.permute.xlu1 %1250 }
 0x3e8   :  { %1519 = vpush %v1224_v46 }
 0x411   :  { %s1514_s3 = spop %1513 }
 0x412   :  { %v1191_v48 = vstv %s1514_s3 }
 0x413   :  { %s1516_s15 = spop %1515 }
 0x414   :  { %v1202_v56 = vstv %s1516_s15 }
 0x415   :  { %s1518_s16 = spop %1517 }
 0x416   :  { %v1214_v50 = vstv %s1518_s16 }
 0x417   :  { %v1227_v54 = vsub.f32 %v1191_v48, %v1214_v50 }
 0x419   :  { %v1228_v55 = vsel %vm540_vm5, %v1214_v50, %v1227_v54  ;;  %s1520_s17 = spop %1519 }
 0x41a   :  { %v1229_v57 = vmul.f32 0.001953125, %v1228_v55  ;;  %v1226_v43 = vstv %s1520_s17 }
 0x41b   :  { %v1230_v59 = vsub.f32 %v1202_v56, %v1226_v43 }
 0x41c   :  { %v1233_v61 = vmul.f32 %v1229_v57, %v1229_v57 }
 0x41d   :  { %v1231_v60 = vsel %vm540_vm5, %v1226_v43, %v1230_v59 }
 0x41e   :  { %v1232_v40 = vmul.f32 0.001953125, %v1231_v60 }
 0x420   :  { %v1234_v62 = vsub.f32 %v1232_v40, %v1233_v61 }
 0x422   :  { %v1235_v63 = vadd.f32 1e-05, %v1234_v62 }
 0x424   :  { %1540 = vrsqrt.f32 %v1235_v63 }
 0x42e   :  { %v1541_v1 = vpop.eup %1540 }
 0x42f   :  { %v1246_v3 = vmul.f32 %v1541_v1, %v1243_v2  ;;  %v1245_v0 = vmul.f32 %v1541_v1, %v1239_v10 }
 0x431   :  { %v1248_v5 = vmul.f32 %v1246_v3, %v1229_v57  ;;  %v1260_v6 = vmul.f32 %v1740_v58, %v1246_v3  ;;  %v1247_v13 = vmul.f32 %v1245_v0, %v1229_v57  ;;  %v1259_v49 = vmul.f32 %v1742_v47, %v1245_v0 }
 0x433   :  { %v1258_v7 = vsub.f32 %v1255_v4, %v1248_v5  ;;  %v1257_v15 = vsub.f32 %v1251_v14, %v1247_v13 }
 0x435   :  { %v1262_v8 = vadd.f32 %v1260_v6, %v1258_v7  ;;  %v1261_v16 = vadd.f32 %v1259_v49, %v1257_v15 }
 0x437   :  { %v1285_v9 = vmul.f32 -1.442695, %v1262_v8 }
 0x439   :  { %1542 = vpow2.f32 %v1285_v9 }
 0x443   :  { %v1543_v11 = vpop.eup %1542 }
 0x444   :  { %v1266_v12 = vadd.f32 1.0, %v1543_v11 }
 0x446   :  { %1544 = vrcp.f32 %v1266_v12 }
 0x450   :  { %v1545_v17 = vpop.eup %1544 }
 0x451   :  { %v1269_v18 = vmul.f32 %v1545_v17, %v1261_v16 }
 0x453   :  { %1270 = vst.msk [vmem:[#allocation2] sm:$0xff] %vm541_vm3, %v1269_v18 }
 0x454   :  { %1557 = shalt.err (!%p1554_p4)
}
 0x455   :  { %s1558_s23 = scalar_lea.hbm %s1790_s5, 128 }
 0x456   :  { %p1559_p5 = scmp.ne.s32.totalorder %s1790_s5, %s1558_s23  ;;  %p1562_p6 = scmp.lt.u32.totalorder %s1558_s23, %s1790_s5 }
 0x458   :  { %p1564_p7 = pnand %p1562_p6, %p1559_p5 }
 0x45a   :  { %1567 = shalt.err (!%p1564_p7)
}
 0x45b   :  { %1280 = dma.vmem_to_hbm [thread:$0]  %s1278_s19, 128, %s1790_s5, [#allocation3]  }
 0x45c   :  { %1568 = dma.done.wait [#allocation3], 128  }
 0x45d   :  { %1569 = vsyncadd [#allocation3], 4294967168 }
 0x45e   :  { %1284 = vsyncpa [#allocation3], 1 }

</bundles_post_ra>
